<compile_context>
chip_gen: v5e
topology: v5e:2x2
jax: 0.10.0
libtpu: 0.0.40
codegen_flags: <defaults>
</compile_context>

<pallas_src>
import math
from functools import partial

import jax
import jax.numpy as jnp
from jax.experimental import pallas as pl
from jax.experimental.pallas import tpu as pltpu


# ----------------------------- hardware-aware defaults -----------------------------

def _physical_vmem_bytes():
    try:
        return int(pltpu.get_tpu_info().vmem_capacity_bytes)
    except Exception:  # hardware query unavailable -> safe (v7x-sized) default
        return 64 << 20


def _device_kind():
    try:
        return jax.devices()[0].device_kind.lower()
    except Exception:
        return ""


_KIND = _device_kind()
_IS_V5E = ("v5e" in _KIND) or ("v5 lite" in _KIND) or ("v5litepod" in _KIND)
_DEFAULT_TM = 128 if _IS_V5E else 256      # projection row tile
_DEFAULT_TQ = 128 if _IS_V5E else 256      # attention q / kv tile
_VMEM_CAP = int(_physical_vmem_bytes() * 0.8)   # headroom below physical VMEM
_RESIDENT_W_BYTES = 8 << 20                # keep a weight slab resident below this


def _vmem_limit(nbytes):
    need = int(nbytes) + (4 << 20)         # compiler-scratch headroom
    return max(min(need, _VMEM_CAP), min(32 << 20, _VMEM_CAP))


def _round_up(x, m):
    return (x + m - 1) // m * m


def _pick_row_tile(t, cap):
    """Largest divisor of t that is a multiple of 8 and <= cap (else t: full dim)."""
    for d in range(min(cap, t), 0, -1):
        if t % d == 0 and d % 8 == 0:
            return d
    return t


def _pick_seq_tile(t, cap):
    """Tile that also appears as a minormost dim: multiple of 128 (else t: full dim)."""
    for d in range(min(cap, t), 0, -1):
        if t % d == 0 and d % 128 == 0:
            return d
    return t


def _pick_col_tile(n, k, itemsize):
    """Weight column tile: full N if it fits residency budget, else a 128-mult divisor."""
    if k * n * itemsize <= _RESIDENT_W_BYTES:
        return n
    tn = (n // 128) * 128
    while tn >= 128:
        if n % tn == 0 and k * tn * itemsize <= _RESIDENT_W_BYTES:
            return tn
        tn -= 128
    return n


def _largest_divisor_leq(n, cap):
    for d in range(min(cap, n), 0, -1):
        if n % d == 0:
            return d
    return 1


# --------------------------- linear: y = x @ W + b (c_attn) ------------------------

def _linear_kernel(x_ref, w_ref, b_ref, o_ref):
    acc = jnp.dot(x_ref[...], w_ref[...], preferred_element_type=jnp.float32)
    o_ref[...] = (acc + b_ref[...].astype(jnp.float32)).astype(o_ref.dtype)


def _linear(x2d, w, b, *, tm, out_dtype=None):
    """y = x2d @ w + b.  w is (K, N) (pre-transposed vs torch Linear); b is (1, N)."""
    M, K = x2d.shape
    kw, N = w.shape
    assert K == kw and b.shape == (1, N)
    out_dtype = out_dtype or x2d.dtype
    itemsize = jnp.dtype(x2d.dtype).itemsize
    out_isz = jnp.dtype(out_dtype).itemsize

    tm_eff = min(int(tm), _round_up(M, 8))
    m_pad = _round_up(M, tm_eff)
    if m_pad != M:                                   # pad tail rows, slice back below
        x2d = jnp.pad(x2d, ((0, m_pad - M), (0, 0)))
    tn = _pick_col_tile(N, K, itemsize)

    vmem = _vmem_limit(
        2 * tm_eff * K * itemsize                    # x tile, double-buffered
        + 2 * K * tn * itemsize                      # weight tile
        + 2 * tm_eff * tn * out_isz                  # out tile
        + tm_eff * tn * 4                            # f32 accumulator
        + 2 * tn * itemsize)
    cost = pl.CostEstimate(
        flops=2 * m_pad * K * N, transcendentals=0,
        bytes_accessed=int((m_pad * K + K * N + N) * itemsize + m_pad * N * out_isz))

    # Weight tile sits on the outer grid axis -> it stays put across the inner M sweep.
    out = pl.pallas_call(
        _linear_kernel,
        out_shape=jax.ShapeDtypeStruct((m_pad, N), out_dtype),
        grid=(N // tn, m_pad // tm_eff),
        in_specs=[
            pl.BlockSpec((tm_eff, K), lambda j, i: (i, 0)),
            pl.BlockSpec((K, tn), lambda j, i: (0, j)),
            pl.BlockSpec((1, tn), lambda j, i: (0, j)),
        ],
        out_specs=pl.BlockSpec((tm_eff, tn), lambda j, i: (i, j)),
        compiler_params=pltpu.CompilerParams(
            dimension_semantics=("parallel", "parallel"),
            vmem_limit_bytes=vmem),
        cost_estimate=cost,
    )(x2d, w, b)
    return out[:M] if m_pad != M else out


# ----------------------- flash-style causal attention kernel -----------------------

def _flash_kernel(q_ref, k_ref, v_ref, o_ref, m_sc, l_sc, acc_sc, *, scale):
    qi = pl.program_id(1)
    ki = pl.program_id(2)

    @pl.when(ki == 0)
    def _init():
        m_sc[...] = jnp.full(m_sc.shape, -jnp.inf, m_sc.dtype)
        l_sc[...] = jnp.zeros(l_sc.shape, l_sc.dtype)
        acc_sc[...] = jnp.zeros(acc_sc.shape, acc_sc.dtype)

    def scores():
        # Scale q once (tq*hd mults) instead of the T x T score tile.
        q = q_ref[...] * scale
        # K arrives pre-transposed as (h, hd, tkv): natural MXU form, no relayout.
        return jnp.einsum("hqd,hdk->hqk", q, k_ref[...],
                          preferred_element_type=jnp.float32)

    def update(s):
        m_prev = m_sc[...]
        m_new = jnp.maximum(m_prev, s.max(axis=-1, keepdims=True))
        alpha = jnp.exp(m_prev - m_new)
        p = jnp.exp(s - m_new)
        l_sc[...] = alpha * l_sc[...] + p.sum(axis=-1, keepdims=True)
        acc_sc[...] = alpha * acc_sc[...] + jnp.einsum(
            "hqk,hkd->hqd", p.astype(v_ref.dtype), v_ref[...],
            preferred_element_type=jnp.float32)
        m_sc[...] = m_new

    @pl.when(ki < qi)                  # fully-visible kv block: no mask work at all
    def _off_diag():
        update(scores())

    @pl.when(ki == qi)                 # diagonal block: only place the mask is applied
    def _diag():
        s = scores()
        row = jax.lax.broadcasted_iota(jnp.int32, s.shape, 1)
        col = jax.lax.broadcasted_iota(jnp.int32, s.shape, 2)
        update(jnp.where(col <= row, s, -1e30))

    # ki > qi: fully masked -> skipped (kv index_map clamps, so no new DMA either).

    @pl.when(ki == pl.num_programs(2) - 1)
    def _finalize():
        inv_l = pl.reciprocal(l_sc[...], approx=True)   # EUP slot; deferred norm
        o_ref[...] = (acc_sc[...] * inv_l).astype(o_ref.dtype)


def _causal_flash_attention(q, k_t, v, *, tq):
    """q, v: (B*n_head, T, hd); k_t: (B*n_head, hd, T).  Returns (B*n_head, T, hd)."""
    BH, T, hd = q.shape
    scale = 1.0 / math.sqrt(hd)
    itemsize = jnp.dtype(q.dtype).itemsize

    tq = _pick_seq_tile(T, tq)         # also a minormost dim (k_t) -> 128-mult or full
    nq = T // tq
    # Heads per grid step: fewer ~0.35us grid steps / denser DMA, bounded by VMEM.
    h_cap = max(1, (8 << 20) // (tq * tq * 4))
    h_blk = _largest_divisor_leq(BH, min(8, h_cap))

    def q_map(g, qi, ki):
        return (g, qi, 0)

    def k_map(g, qi, ki):
        return (g, 0, jnp.minimum(ki, qi))   # clamp: skipped steps re-use last block

    def v_map(g, qi, ki):
        return (g, jnp.minimum(ki, qi), 0)

    vmem = _vmem_limit(
        8 * h_blk * tq * hd * itemsize       # q, k, v, o blocks double-buffered
        + h_blk * tq * (hd + 2) * 4          # f32 accumulators (acc, m, l)
        + 3 * h_blk * tq * tq * 4)           # f32 score / prob temporaries
    cost = pl.CostEstimate(
        flops=2 * BH * T * T * hd,           # ~half of dense (causal skipping)
        transcendentals=BH * T * T // 2,
        bytes_accessed=int(4 * BH * T * hd * itemsize))

    return pl.pallas_call(
        partial(_flash_kernel, scale=scale),
        out_shape=jax.ShapeDtypeStruct((BH, T, hd), q.dtype),
        grid=(BH // h_blk, nq, nq),
        in_specs=[
            pl.BlockSpec((h_blk, tq, hd), q_map),
            pl.BlockSpec((h_blk, hd, tq), k_map),
            pl.BlockSpec((h_blk, tq, hd), v_map),
        ],
        out_specs=pl.BlockSpec((h_blk, tq, hd), q_map),
        scratch_shapes=[
            pltpu.VMEM((h_blk, tq, 1), jnp.float32),
            pltpu.VMEM((h_blk, tq, 1), jnp.float32),
            pltpu.VMEM((h_blk, tq, hd), jnp.float32),
        ],
        compiler_params=pltpu.CompilerParams(
            dimension_semantics=("parallel", "parallel", "arbitrary"),
            vmem_limit_bytes=vmem),
        cost_estimate=cost,
    )(q, k_t, v)


# ------------------- c_proj with the head merge fused into BlockSpecs --------------

def _proj_kernel(y_ref, w_ref, b_ref, o_ref, acc_ref):
    h = pl.program_id(1)

    @pl.when(h == 0)
    def _zero():
        acc_ref[...] = jnp.zeros(acc_ref.shape, acc_ref.dtype)

    acc_ref[...] += jnp.dot(y_ref[...], w_ref[...],
                            preferred_element_type=jnp.float32)

    @pl.when(h == pl.num_programs(1) - 1)
    def _store():
        o_ref[...] = (acc_ref[...] + b_ref[...].astype(jnp.float32)).astype(o_ref.dtype)


def _merge_heads_proj(y, w, b, *, tm, out_dtype):
    """c_proj consuming the attention output directly as (B, n_head, T, hd):
    the head merge is a reduction over the n_head grid axis (no XLA transpose)."""
    B, n_head, T, hd = y.shape
    C = n_head * hd
    assert w.shape == (C, C) and b.shape == (1, C)
    itemsize = jnp.dtype(y.dtype).itemsize
    out_isz = jnp.dtype(out_dtype).itemsize

    w_h = w.reshape(n_head, hd, C)         # free reshape: input features are head-major
    tm_rows = _pick_row_tile(T, tm)
    tpb = T // tm_rows                     # row tiles per batch element
    M = B * T

    vmem = _vmem_limit(
        2 * tm_rows * hd * itemsize
        + 2 * hd * C * itemsize
        + 2 * tm_rows * C * out_isz
        + tm_rows * C * 4
        + 2 * C * itemsize)
    cost = pl.CostEstimate(
        flops=2 * M * C * C, transcendentals=0,
        bytes_accessed=int((M * C + C * C + C) * itemsize + M * C * out_isz))

    return pl.pallas_call(
        _proj_kernel,
        out_shape=jax.ShapeDtypeStruct((M, C), out_dtype),
        grid=(M // tm_rows, n_head),
        in_specs=[
            pl.BlockSpec((None, None, tm_rows, hd),
                         lambda i, h: (i // tpb, h, i % tpb, 0)),
            pl.BlockSpec((None, hd, C), lambda i, h: (h, 0, 0)),
            pl.BlockSpec((1, C), lambda i, h: (0, 0)),
        ],
        out_specs=pl.BlockSpec((tm_rows, C), lambda i, h: (i, 0)),
        scratch_shapes=[pltpu.VMEM((tm_rows, C), jnp.float32)],
        compiler_params=pltpu.CompilerParams(
            dimension_semantics=("parallel", "arbitrary"),
            vmem_limit_bytes=vmem),
        cost_estimate=cost,
    )(y, w_h, b)


# --------------------------------- full forward pass -------------------------------

def causal_self_attention(x, w_attn, b_attn, w_proj, b_proj, n_head,
                          *, compute_dtype=jnp.bfloat16, tm=None, tq=None):
    """GPT-2 CausalSelfAttention forward.

    x: (B, T, C).  Weights pre-transposed vs torch.nn.Linear:
    w_attn (C, 3C), b_attn (1, 3C), w_proj (C, C), b_proj (1, C).
    Matmul operands run in `compute_dtype` (bf16 MXU fast path by default);
    accumulation and softmax are always f32.  Returns (B, T, C) in x.dtype.
    """
    B, T, C = x.shape
    assert C % n_head == 0
    hd = C // n_head
    M = B * T
    BH = B * n_head
    out_dtype = x.dtype
    cdt = compute_dtype or x.dtype
    tm = tm or _DEFAULT_TM
    tq = tq or _DEFAULT_TQ
    cast = lambda a: a.astype(cdt)

    # qkv = c_attn(x): (M, 3C) in compute dtype.
    qkv = _linear(cast(x).reshape(M, C), cast(w_attn), cast(b_attn), tm=tm)
    qkv = qkv.reshape(B, T, 3, n_head, hd)

    # Head split.  K is laid out (BH, hd, T) so the in-kernel QK^T is in natural
    # MXU form (no per-step relayout); Q/V stay (BH, T, hd).
    q = qkv[:, :, 0].transpose(0, 2, 1, 3).reshape(BH, T, hd)
    k_t = qkv[:, :, 1].transpose(0, 2, 3, 1).reshape(BH, hd, T)
    v = qkv[:, :, 2].transpose(0, 2, 1, 3).reshape(BH, T, hd)

    y = _causal_flash_attention(q, k_t, v, tq=tq)                 # (BH, T, hd)

    # c_proj with the head merge fused into the kernel (no XLA merge transpose).
    out = _merge_heads_proj(y.reshape(B, n_head, T, hd), cast(w_proj),
                            cast(b_proj), tm=tm, out_dtype=out_dtype)
    return out.reshape(B, T, C)


# --------------------------------- utilities / test --------------------------------

def init_params(key, n_embd):
    """nn.Linear-style init; weights stored transposed as (in, out)."""
    k1, k2, k3, k4 = jax.random.split(key, 4)
    bound = 1.0 / math.sqrt(n_embd)
    w_attn = jax.random.uniform(k1, (n_embd, 3 * n_embd), jnp.float32, -bound, bound)
    b_attn = jax.random.uniform(k2, (1, 3 * n_embd), jnp.float32, -bound, bound)
    w_proj = jax.random.uniform(k3, (n_embd, n_embd), jnp.float32, -bound, bound)
    b_proj = jax.random.uniform(k4, (1, n_embd), jnp.float32, -bound, bound)
    return w_attn, b_attn, w_proj, b_proj


def attention_reference(x, w_attn, b_attn, w_proj, b_proj, n_head):
    """Pure-JAX f32 reference matching the PyTorch forward pass."""
    x, w_attn, b_attn, w_proj, b_proj = (
        a.astype(jnp.float32) for a in (x, w_attn, b_attn, w_proj, b_proj))
    B, T, C = x.shape
    hd = C // n_head
    qkv = jnp.einsum("btc,cn->btn", x, w_attn, precision="highest") + b_attn[0]
    q, k, v = jnp.split(qkv, 3, axis=2)

    def heads(a):
        return a.reshape(B, T, n_head, hd).transpose(0, 2, 1, 3)

    q, k, v = heads(q), heads(k), heads(v)
    s = jnp.einsum("bhtd,bhsd->bhts", q, k, precision="highest") / math.sqrt(hd)
    mask = jnp.tril(jnp.ones((T, T), dtype=bool))
    s = jnp.where(mask[None, None], s, -jnp.inf)
    p = jax.nn.softmax(s, axis=-1)
    y = jnp.einsum("bhts,bhsd->bhtd", p, v, precision="highest")
    y = y.transpose(0, 2, 1, 3).reshape(B, T, C)
    return jnp.einsum("btc,co->bto", y, w_proj, precision="highest") + b_proj[0]


if __name__ == "__main__":
    # Small GPT-2-like config (block_size >= T, n_embd % n_head == 0).
    B, T, n_embd, n_head = 2, 8, 32, 4

    key = jax.random.PRNGKey(0)
    k_x, k_p = jax.random.split(key)
    x = jax.random.normal(k_x, (B, T, n_embd), jnp.float32)
    w_attn, b_attn, w_proj, b_proj = init_params(k_p, n_embd)

    # Default bf16-operand fast path: compare against an f32 reference fed the
    # same bf16-rounded operands.
    out = causal_self_attention(x, w_attn, b_attn, w_proj, b_proj, n_head)
    out = jax.block_until_ready(out)
    assert out.shape == (B, T, n_embd) and out.dtype == x.dtype
    rd = lambda a: a.astype(jnp.bfloat16).astype(jnp.float32)
    ref_bf = attention_reference(rd(x), rd(w_attn), rd(b_attn), rd(w_proj),
                                 rd(b_proj), n_head)
    assert jnp.allclose(out.astype(jnp.float32), ref_bf, atol=3e-2, rtol=3e-2), \
        "bf16 path mismatch vs reference"

    # Full-f32 compute path.
    out32 = causal_self_attention(x, w_attn, b_attn, w_proj, b_proj, n_head,
                                  compute_dtype=jnp.float32)
    out32 = jax.block_until_ready(out32)
    ref32 = attention_reference(x, w_attn, b_attn, w_proj, b_proj, n_head)
    assert jnp.allclose(out32, ref32, atol=1e-2, rtol=1e-2), \
        "f32 path mismatch vs reference"

    print("KERNEL_OK")
</pallas_src>

<mosaic_0001>
module attributes {stable_mosaic.version = 11 : i64} {
  func.func @_linear_kernel(%arg0: i32, %arg1: i32, %arg2: memref<16x32xbf16, #tpu.memory_space<vmem>>, %arg3: memref<32x96xbf16, #tpu.memory_space<vmem>>, %arg4: memref<1x96xbf16, #tpu.memory_space<vmem>>, %arg5: memref<16x96xbf16, #tpu.memory_space<vmem>>) attributes {dimension_semantics = [#tpu.dimension_semantics<parallel>, #tpu.dimension_semantics<parallel>], iteration_bounds = array<i64: 1, 1>, scalar_prefetch = 0 : i64, scratch_operands = 0 : i64, tpu.core_type = #tpu.core_type<tc>, window_params = [{transform_indices = @transform_0, window_bounds = array<i64: 16, 32>}, {transform_indices = @transform_1, window_bounds = array<i64: 32, 96>}, {transform_indices = @transform_2, window_bounds = array<i64: 1, 96>}, {transform_indices = @transform_3, window_bounds = array<i64: 16, 96>}]} {
    %c0 = arith.constant 0 : index
    %c0_0 = arith.constant 0 : index
    %0 = vector.load %arg2[%c0, %c0_0] : memref<16x32xbf16, #tpu.memory_space<vmem>>, vector<16x32xbf16>
    %c0_1 = arith.constant 0 : index
    %c0_2 = arith.constant 0 : index
    %1 = vector.load %arg3[%c0_1, %c0_2] : memref<32x96xbf16, #tpu.memory_space<vmem>>, vector<32x96xbf16>
    %cst = arith.constant dense<0.000000e+00> : vector<16x96xf32>
    %2 = tpu.matmul %0, %1, %cst {dimension_numbers = #tpu.dot_dimension_numbers<[1], [0], [0], [1], [0, 0, 1, 1], [], []>} : vector<16x32xbf16>, vector<32x96xbf16>, vector<16x96xf32> -> vector<16x96xf32>
    %c0_3 = arith.constant 0 : index
    %c0_4 = arith.constant 0 : index
    %3 = vector.load %arg4[%c0_3, %c0_4] : memref<1x96xbf16, #tpu.memory_space<vmem>>, vector<1x96xbf16>
    %4 = arith.extf %3 : vector<1x96xbf16> to vector<1x96xf32>
    %5 = vector.broadcast %4 : vector<1x96xf32> to vector<16x96xf32>
    %6 = arith.addf %2, %5 : vector<16x96xf32>
    %7 = arith.truncf %6 : vector<16x96xf32> to vector<16x96xbf16>
    %c0_5 = arith.constant 0 : index
    %c0_6 = arith.constant 0 : index
    %8 = vector.load %arg5[%c0_5, %c0_6] : memref<16x96xbf16, #tpu.memory_space<vmem>>, vector<16x96xbf16>
    tpu.vector_store %arg5[%c0_5, %c0_6], %7 {strides = array<i32>} : memref<16x96xbf16, #tpu.memory_space<vmem>>, vector<16x96xbf16>,
    return
  }
  func.func @transform_0(%arg0: i32, %arg1: i32) -> (i32, i32) {
    %c0_i32 = arith.constant 0 : i32
    %c0_i32_0 = arith.constant 0 : i32
    return %arg1, %c0_i32 : i32, i32
  }
  func.func @transform_1(%arg0: i32, %arg1: i32) -> (i32, i32) {
    %c0_i32 = arith.constant 0 : i32
    %c0_i32_0 = arith.constant 0 : i32
    return %c0_i32, %arg0 : i32, i32
  }
  func.func @transform_2(%arg0: i32, %arg1: i32) -> (i32, i32) {
    %c0_i32 = arith.constant 0 : i32
    %c0_i32_0 = arith.constant 0 : i32
    return %c0_i32, %arg0 : i32, i32
  }
  func.func @transform_3(%arg0: i32, %arg1: i32) -> (i32, i32) {
    %c0_i32 = arith.constant 0 : i32
    return %arg1, %arg0 : i32, i32
  }
}

</mosaic_0001>

<bundles_post_ra>
// kernel: tpu_custom_call.1
= control target key start
LH: loop header
LB: loop body
LE: loop exit
PB: predicated region body
PF: predicated region fallthrough
CT: control target
= control target key end

     0   :  { %8 = vsyncpa [#allocation3], 0  ;;  %s262_s0 = inlined_call_operand.hbm [shape: bf16[16,32], index: 0, kind: input, shape index: {}]   ;;  %s263_s1 = inlined_call_operand.hbm [shape: bf16[32,96], index: 1, kind: input, shape index: {}]   ;;  %s264_s2 = inlined_call_operand.vmem [shape: bf16[1,96], index: 2, kind: input, shape index: {}]   ;;  %s265_s3 = inlined_call_operand.hbm [shape: bf16[16,96], index: 3, kind: output, shape index: {}]  }
   0x1   :  { %9 = vsyncpa [#allocation6], 0 }
   0x2   :  { %10 = vsyncpa [#allocation4], 0  ;;  %s15_s14 = sshll.u32 %s262_s0, 4  ;;  %s216_s15 = smov [#allocation2]   ;;  %s16_s14 = int_to_ptr.hbm [resolvable:$true] %s15_s14 }
   0x3   :  { %s17_s16 = sshll.u32 %s216_s15, 4  ;;  %s28_s19 = sshll.u32 %s263_s1, 4  ;;  %s18_s16 = int_to_ptr.vmem [resolvable:$true] %s17_s16  ;;  %s29_s19 = int_to_ptr.hbm [resolvable:$true] %s28_s19 }
   0x4   :  { %s217_s20 = smov 64   ;;  %s218_s21 = smov 4  }
   0x5   :  { %23 = dma.hbm_to_vmem [thread:$0]  %s16_s14, 128, %s18_s16, [#allocation3], %s217_s20, %s217_s20, %s218_s21  }
   0x6   :  { %s219_s22 = smov [#allocation5]  }
   0x7   :  { %s30_s23 = sshll.u32 %s219_s22, 4  ;;  %s31_s23 = int_to_ptr.vmem [resolvable:$true] %s30_s23 }
   0x8   :  { %36 = dma.hbm_to_vmem [thread:$0]  %s29_s19, 256, %s31_s23, [#allocation6], %s217_s20, %s217_s20, %s218_s21  }
   0x9   :  { %210 = dma.done.wait [#allocation3], 128  }
   0xa   :  { %211 = vsyncadd [#allocation3], 4294967168 }
   0xb   :  { %212 = dma.done.wait [#allocation6], 256  }
   0xc   :  { %213 = vsyncadd [#allocation6], 4294967040  ;;  %v132_v0 = vld [vmem:[#allocation5 + $0x8] sm:$0xff]  ;;  %v131_v1 = vld [vmem:[#allocation5] sm:$0xff]  ;;  %vm74_vm0 = vcmask 261120   ;;  %vm94_vm1 = vcmask 781312  }
   0xd   :  { %84 = vmatpush.bf16.msra.mxu0 %v132_v0  ;;  %v130_v2 = vld [vmem:[#allocation2] sm:$0xff]  ;;  %s220_s24 = smov [#allocation7]   ;;  %s103_s28 = sshll.u32 %s265_s3, 4  ;;  %s104_s28 = int_to_ptr.hbm [resolvable:$true] %s103_s28 }
   0xe   :  { %v54_v3 = vld [vmem:[%s264_s2] sm:$0x1]  ;;  %s101_s25 = sshll.u32 %s220_s24, 4  ;;  %s102_s25 = int_to_ptr.vmem [resolvable:$true] %s101_s25 }
   0xf   :  { %v55_v4 = vunpack.c.l.bf16 %v54_v3 }
  0x11   :  { %85 = vmatpush.bf16.msra.mxu0 %v131_v1  ;;  %v56_v5 = vperm.slane %v55_v4, 0 }
  0x14   :  { %129 = vmatmul.msk.bf16.vlgmr.msra.gmra.mxu0 %vm74_vm0, %v130_v2 }
  0x91   :  { %v87_v6 = vpop.f32.mrf.mxu0 }
  0x92   :  { %v88_v7 = vadd.f32 %v87_v6, %v56_v5 }
  0x94   :  { %v92_v8 = vpack.c.bf16 %v88_v7, %v88_v7 }
  0x96   :  { %95 = vst.msk [vmem:[#allocation7] sm:$0xf] %vm94_vm1, %v92_v8 }
  0x99   :  { %v89_v9 = vpop.f32.mrf.mxu0 }
  0x9a   :  { %v90_v10 = vadd.f32 %v89_v9, %v56_v5 }
  0x9c   :  { %v93_v11 = vpack.c.bf16 %v90_v10, %v90_v10 }
  0x9e   :  { %96 = vst.msk [vmem:[#allocation7 + $0x4] sm:$0xf] %vm94_vm1, %v93_v11 }
  0x9f   :  { %109 = dma.vmem_to_hbm [thread:$0]  %s102_s25, 128, %s104_s28, [#allocation4], %s217_s20, %s217_s20, %s218_s21  }
  0xa0   :  { %214 = dma.done.wait [#allocation4], 128  }
  0xa1   :  { %215 = vsyncadd [#allocation4], 4294967168 }
  0xa2   :  { %114 = vsyncpa [#allocation3], 1 }
  0xa3   :  { %115 = vsyncpa [#allocation6], 1 }
  0xa4   :  { %116 = vsyncpa [#allocation4], 1 }

</bundles_post_ra>
